<compile_context>
chip_gen: v5e
topology: v5e:2x2
jax: 0.10.0
libtpu: 0.0.40
codegen_flags: <defaults>
</compile_context>

<pallas_src>
import functools

import jax
import jax.numpy as jnp
from jax.experimental import pallas as pl
from jax.experimental.pallas import tpu as pltpu


def _weighted_seq_loss_kernel(x_ref, t_ref, w_ref, out_ref, acc_ref, *, neg_scale):
    """Grid = (T tiles [parallel], C tiles [reduction, innermost])."""
    j = pl.program_id(1)  # C-tile index (reduction axis)

    @pl.when(j == 0)
    def _init():
        acc_ref[...] = jnp.zeros_like(acc_ref)

    x = x_ref[...].astype(jnp.float32)   # upcast in-vreg; HBM traffic stays at input dtype
    t = t_ref[...]                       # (B, tT) int32, resident across C tiles
    B, tT, tC = x.shape

    # Tile-aware gather: global class id of lane c in this C tile is j*tC + c.
    cls = jax.lax.broadcasted_iota(jnp.int32, (B, tT, tC), 2) + j * tC
    sel = jnp.where(cls == t[:, :, None], x, 0.0)                      # select, no one-hot mul
    contrib = jnp.sum(jnp.sum(sel, axis=-1), axis=-1, keepdims=True)   # (B, 1)
    acc_ref[...] += contrib

    @pl.when(j == pl.num_programs(1) - 1)
    def _finalize():
        # Fold the NLL negation and the 1/T (avg='token') scaling into the weight multiply.
        per_tile = neg_scale * acc_ref[...] * w_ref[...]   # (B, 1)
        out_ref[...] = per_tile.reshape(out_ref.shape)     # (1, B, 1) partial for this T tile


def weighted_sequence_loss(inputs, targets, weight, avg="token", t_tile=None, c_tile=None):
    """Pallas TPU implementation of WeightedSequenceLoss.forward.

    inputs:  [B, T, C] log-probabilities (float32 or bfloat16)
    targets: [B, T]    integer class indices (negative => contributes 0, a la ignore_index)
    weight:  [B]       per-example weights
    returns: scalar float32 loss

    Callers overriding t_tile/c_tile should pass multiples of 128 (or values >= T / >= C).
    """
    B, T, C = inputs.shape
    itemsize = jnp.dtype(inputs.dtype).itemsize

    # ---- tile selection --------------------------------------------------------------------
    # Class (lane) tile: full C when modest, else 2048 (multiple of 128) for huge vocabs.
    if c_tile is not None:
        tC = min(int(c_tile), C)
    else:
        tC = C if C <= 2048 else 2048
    # Sequence tile: largest multiple of 128 whose input block fits a ~4 MiB budget
    # (x2 for double buffering -> ~8 MiB, well inside the 32 MiB scoped VMEM requested below).
    if t_tile is not None:
        tT = min(int(t_tile), T)
    else:
        block_budget = 4 * 1024 * 1024
        max_tT = block_budget // max(1, B * tC * itemsize)
        tT = T if T <= max_tT else max(128, (max_tT // 128) * 128)

    # ---- pad T / C so every block either tiles evenly or is a full extent -------------------
    T_pad = -(-T // tT) * tT
    C_pad = -(-C // tC) * tC
    if T_pad != T or C_pad != C:
        inputs = jnp.pad(inputs, ((0, 0), (0, T_pad - T), (0, C_pad - C)))
    if T_pad != T:
        # Padded tokens get target -1: never matches a class, contributes 0 to the sum.
        targets = jnp.pad(targets, ((0, 0), (0, T_pad - T)), constant_values=-1)

    num_t = T_pad // tT
    num_c = C_pad // tC

    # avg='token' divides by the ORIGINAL T (loss.mean(axis=1) in the module), not T_pad.
    neg_scale = (-1.0 / T) if avg == "token" else -1.0

    grid_spec = pltpu.PrefetchScalarGridSpec(
        num_scalar_prefetch=0,
        grid=(num_t, num_c),
        in_specs=[
            pl.BlockSpec((B, tT, tC), lambda i, j: (0, i, j)),   # streamed log-probs
            pl.BlockSpec((B, tT), lambda i, j: (0, i)),          # targets, resident across C
            pl.BlockSpec((B, 1), lambda i, j: (0, 0)),           # weights, resident
        ],
        out_specs=pl.BlockSpec((1, B, 1), lambda i, j: (i, 0, 0)),  # per-T-tile partial
        scratch_shapes=[pltpu.VMEM((B, 1), jnp.float32)],           # resident accumulator
    )

    partials = pl.pallas_call(
        functools.partial(_weighted_seq_loss_kernel, neg_scale=neg_scale),
        out_shape=jax.ShapeDtypeStruct((num_t, B, 1), jnp.float32),
        grid_spec=grid_spec,
        compiler_params=pltpu.CompilerParams(
            dimension_semantics=("parallel", "arbitrary"),  # T tiles may split across TCs (v7x)
            vmem_limit_bytes=32 * 1024 * 1024,
        ),
        cost_estimate=pl.CostEstimate(
            flops=3 * B * T_pad * C_pad,
            transcendentals=0,
            bytes_accessed=(B * T_pad * C_pad * itemsize  # log-probs, read once
                            + B * T_pad * 4               # targets
                            + B * 4                       # weights
                            + num_t * B * 4),             # partial outputs
        ),
    )(
        inputs,                                   # keep HBM dtype (bf16 stays bf16)
        targets.astype(jnp.int32),
        weight.reshape(B, 1).astype(jnp.float32),
    )

    # Tiny final reduction over the per-T-tile partials (num_t * B values).
    return jnp.sum(partials)


def _reference(inputs, targets, weight, avg="token"):
    # Pure-JAX reference mirroring the PyTorch module (same values as the kernel sees).
    x = inputs.astype(jnp.float32)
    nll = -jnp.take_along_axis(x, targets[..., None].astype(jnp.int32), axis=-1)[..., 0]  # [B, T]
    reduced = nll.mean(axis=1) if avg == "token" else nll.sum(axis=1)                     # [B]
    return jnp.dot(reduced, weight.astype(reduced.dtype))


if __name__ == "__main__":
    key = jax.random.PRNGKey(0)

    # --- Check 1: canonical small shape, f32, single-tile path, avg='token' ---
    B, T, C = 2, 8, 32
    k1, k2, k3, key = jax.random.split(key, 4)
    logits = jax.random.normal(k1, (B, T, C), dtype=jnp.float32)
    inputs = jax.nn.log_softmax(logits, axis=-1)          # NLLLoss expects log-probs
    targets = jax.random.randint(k2, (B, T), 0, C, dtype=jnp.int32)
    weight = jax.random.uniform(k3, (B,), dtype=jnp.float32)

    loss = jax.block_until_ready(weighted_sequence_loss(inputs, targets, weight, avg="token"))
    ref = _reference(inputs, targets, weight, avg="token")
    assert jnp.allclose(loss, ref, atol=1e-5, rtol=1e-5), (loss, ref)

    # --- Check 2: gridded path (T & C tiling + C padding), bf16 inputs, avg='sum' ---
    B2, T2, C2 = 2, 256, 320
    k1, k2, k3, key = jax.random.split(key, 4)
    logits2 = jax.random.normal(k1, (B2, T2, C2), dtype=jnp.float32)
    inputs2 = jax.nn.log_softmax(logits2, axis=-1).astype(jnp.bfloat16)
    targets2 = jax.random.randint(k2, (B2, T2), 0, C2, dtype=jnp.int32)
    weight2 = jax.random.uniform(k3, (B2,), dtype=jnp.float32)

    loss2 = jax.block_until_ready(
        weighted_sequence_loss(inputs2, targets2, weight2, avg="sum", t_tile=128, c_tile=128))
    ref2 = _reference(inputs2, targets2, weight2, avg="sum")
    assert jnp.allclose(loss2, ref2, atol=5e-2, rtol=1e-3), (loss2, ref2)

    print("KERNEL_OK")
</pallas_src>

<mosaic_0001>
module attributes {stable_mosaic.version = 11 : i64} {
  func.func @_weighted_seq_loss_kernel(%arg0: i32, %arg1: i32, %arg2: memref<2x8x32xf32, #tpu.memory_space<vmem>>, %arg3: memref<2x8xi32, #tpu.memory_space<vmem>>, %arg4: memref<2x1xf32, #tpu.memory_space<vmem>>, %arg5: memref<1x2x1xf32, #tpu.memory_space<vmem>>, %arg6: memref<2x1xf32, #tpu.memory_space<vmem>>) attributes {dimension_semantics = [#tpu.dimension_semantics<parallel>, #tpu.dimension_semantics<arbitrary>], iteration_bounds = array<i64: 1, 1>, scalar_prefetch = 0 : i64, scratch_operands = 1 : i64, tpu.core_type = #tpu.core_type<tc>, window_params = [{transform_indices = @transform_0, window_bounds = array<i64: 2, 8, 32>}, {transform_indices = @transform_1, window_bounds = array<i64: 2, 8>}, {pipeline_mode = #tpu.pipeline_mode<synchronous>, transform_indices = @transform_2, window_bounds = array<i64: 2, 1>}, {transform_indices = @transform_3, window_bounds = array<i64: 1, 2, 1>}]} {
    %c0_i32 = arith.constant 0 : i32
    %0 = arith.cmpi eq, %arg1, %c0_i32 : i32
    %1 = arith.extui %0 : i1 to i32
    %c0_i32_0 = arith.constant 0 : i32
    %2 = arith.cmpi ne, %1, %c0_i32_0 : i32
    scf.if %2 {
      %cst_13 = arith.constant 0.000000e+00 : f32
      %23 = vector.broadcast %cst_13 : f32 to vector<2x1xf32>
      %c0_14 = arith.constant 0 : index
      %c0_15 = arith.constant 0 : index
      %24 = vector.load %arg6[%c0_14, %c0_15] : memref<2x1xf32, #tpu.memory_space<vmem>>, vector<2x1xf32>
      tpu.vector_store %arg6[%c0_14, %c0_15], %23 {strides = array<i32>} : memref<2x1xf32, #tpu.memory_space<vmem>>, vector<2x1xf32>,
    } else {
    }
    %c0 = arith.constant 0 : index
    %c0_1 = arith.constant 0 : index
    %c0_2 = arith.constant 0 : index
    %3 = vector.load %arg2[%c0, %c0_1, %c0_2] : memref<2x8x32xf32, #tpu.memory_space<vmem>>, vector<2x8x32xf32>
    %c0_3 = arith.constant 0 : index
    %c0_4 = arith.constant 0 : index
    %4 = vector.load %arg3[%c0_3, %c0_4] : memref<2x8xi32, #tpu.memory_space<vmem>>, vector<2x8xi32>
    %5 = tpu.iota {dimensions = array<i32: 2>} : vector<2x8x32xi32>
    %c32_i32 = arith.constant 32 : i32
    %6 = arith.muli %arg1, %c32_i32 : i32
    %7 = vector.broadcast %6 : i32 to vector<2x8x32xi32>
    %8 = arith.addi %5, %7 : vector<2x8x32xi32>
    %9 = vector.shape_cast %4 : vector<2x8xi32> to vector<2x8x1xi32>
    %10 = vector.broadcast %9 : vector<2x8x1xi32> to vector<2x8x32xi32>
    %11 = arith.cmpi eq, %8, %10 : vector<2x8x32xi32>
    %cst = arith.constant 0.000000e+00 : f32
    %12 = vector.broadcast %cst : f32 to vector<2x8x32xf32>
    %13 = arith.select %11, %3, %12 : vector<2x8x32xi1>, vector<2x8x32xf32>
    %cst_5 = arith.constant dense<0.000000e+00> : vector<2x8xf32>
    %14 = vector.multi_reduction <add>, %13, %cst_5 [2] : vector<2x8x32xf32> to vector<2x8xf32>
    %cst_6 = arith.constant dense<0.000000e+00> : vector<2xf32>
    %15 = vector.multi_reduction <add>, %14, %cst_6 [1] : vector<2x8xf32> to vector<2xf32>
    %16 = vector.shape_cast %15 : vector<2xf32> to vector<2x1xf32>
    %c0_7 = arith.constant 0 : index
    %c0_8 = arith.constant 0 : index
    %17 = vector.load %arg6[%c0_7, %c0_8] : memref<2x1xf32, #tpu.memory_space<vmem>>, vector<2x1xf32>
    %18 = arith.addf %17, %16 : vector<2x1xf32>
    %c0_9 = arith.constant 0 : index
    %c0_10 = arith.constant 0 : index
    %19 = vector.load %arg6[%c0_9, %c0_10] : memref<2x1xf32, #tpu.memory_space<vmem>>, vector<2x1xf32>
    tpu.vector_store %arg6[%c0_9, %c0_10], %18 {strides = array<i32>} : memref<2x1xf32, #tpu.memory_space<vmem>>, vector<2x1xf32>,
    %c0_i32_11 = arith.constant 0 : i32
    %20 = arith.cmpi eq, %arg1, %c0_i32_11 : i32
    %21 = arith.extui %20 : i1 to i32
    %c0_i32_12 = arith.constant 0 : i32
    %22 = arith.cmpi ne, %21, %c0_i32_12 : i32
    scf.if %22 {
      %c0_13 = arith.constant 0 : index
      %c0_14 = arith.constant 0 : index
      %23 = vector.load %arg6[%c0_13, %c0_14] : memref<2x1xf32, #tpu.memory_space<vmem>>, vector<2x1xf32>
      %cst_15 = arith.constant -1.250000e-01 : f32
      %24 = vector.broadcast %cst_15 : f32 to vector<2x1xf32>
      %25 = arith.mulf %24, %23 : vector<2x1xf32>
      %c0_16 = arith.constant 0 : index
      %c0_17 = arith.constant 0 : index
      %26 = vector.load %arg4[%c0_16, %c0_17] : memref<2x1xf32, #tpu.memory_space<vmem>>, vector<2x1xf32>
      %27 = arith.mulf %25, %26 : vector<2x1xf32>
      %28 = vector.shape_cast %27 : vector<2x1xf32> to vector<1x2x1xf32>
      %c0_18 = arith.constant 0 : index
      %c0_19 = arith.constant 0 : index
      %c0_20 = arith.constant 0 : index
      %29 = vector.load %arg5[%c0_18, %c0_19, %c0_20] : memref<1x2x1xf32, #tpu.memory_space<vmem>>, vector<1x2x1xf32>
      tpu.vector_store %arg5[%c0_18, %c0_19, %c0_20], %28 {strides = array<i32>} : memref<1x2x1xf32, #tpu.memory_space<vmem>>, vector<1x2x1xf32>,
    } else {
    }
    return
  }
  func.func @transform_0(%arg0: i32, %arg1: i32) -> (i32, i32, i32) {
    %c0_i32 = arith.constant 0 : i32
    %c0_i32_0 = arith.constant 0 : i32
    return %c0_i32, %arg0, %arg1 : i32, i32, i32
  }
  func.func @transform_1(%arg0: i32, %arg1: i32) -> (i32, i32) {
    %c0_i32 = arith.constant 0 : i32
    %c0_i32_0 = arith.constant 0 : i32
    return %c0_i32, %arg0 : i32, i32
  }
  func.func @transform_2(%arg0: i32, %arg1: i32) -> (i32, i32) {
    %c0_i32 = arith.constant 0 : i32
    %c0_i32_0 = arith.constant 0 : i32
    %c0_i32_1 = arith.constant 0 : i32
    return %c0_i32, %c0_i32_0 : i32, i32
  }
  func.func @transform_3(%arg0: i32, %arg1: i32) -> (i32, i32, i32) {
    %c0_i32 = arith.constant 0 : i32
    %c0_i32_0 = arith.constant 0 : i32
    %c0_i32_1 = arith.constant 0 : i32
    return %arg0, %c0_i32, %c0_i32_0 : i32, i32, i32
  }
}

</mosaic_0001>

<bundles_post_ra>
// kernel: tpu_custom_call.1
= control target key start
LH: loop header
LB: loop body
LE: loop exit
PB: predicated region body
PF: predicated region fallthrough
CT: control target
= control target key end

     0   :  { %8 = vsyncpa [#allocation4], 0  ;;  %s128_s15 = smov [#allocation3]   ;;  %s129_s17 = smov 128   ;;  %s167_s0 = inlined_call_operand.hbm [shape: f32[2,8,32], index: 0, kind: input, shape index: {}]   ;;  %s168_s1 = inlined_call_operand.vmem [shape: s32[2,8], index: 1, kind: input, shape index: {}]   ;;  %s169_s2 = inlined_call_operand.vmem [shape: f32[2,1], index: 2, kind: input, shape index: {}]   ;;  %s170_s3 = inlined_call_operand.vmem [shape: f32[1,2,1], index: 3, kind: output, shape index: {}]  }
   0x1   :  { %s13_s14 = sshll.u32 %s167_s0, 4  ;;  %s15_s16 = sshll.u32 %s128_s15, 4  ;;  %s14_s14 = int_to_ptr.hbm [resolvable:$true] %s13_s14  ;;  %s16_s16 = int_to_ptr.vmem [resolvable:$true] %s15_s16 }
   0x2   :  { %s130_s18 = smov 8  }
   0x3   :  { %21 = dma.hbm_to_vmem [thread:$0]  %s14_s14, 256, %s16_s16, [#allocation4], %s129_s17, %s129_s17, %s130_s18  }
   0x4   :  { %126 = dma.done.wait [#allocation4], 256  }
   0x5   :  { %127 = vsyncadd [#allocation4], 4294967040  ;;  %v39_v0 = vlaneseq  ;;  %v38_v2 = vld [vmem:[%s168_s1] sm:$0x3]  ;;  %v36_v6 = vld [vmem:[#allocation3] sm:$0xff]  ;;  %vm62_vm0 = vcmask 261120  }
   0x6   :  { %v44_v3 = vperm.slane %v38_v2, 0  ;;  %v51_v4 = vperm.slane %v38_v2, 1  ;;  %v37_v10 = vld [vmem:[#allocation3 + $0x8] sm:$0xff]  ;;  %vm34_vm3 = vcmask 1024   ;;  %v131_v14 = vmov 0.0  }
   0x7   :  { %v46_v1 = vshrl.u32 %v39_v0, 7  ;;  %v40_v5 = vand.u32 127, %v39_v0  ;;  %35 = vst.msk [vmem:[#allocation2] sm:$0x3] %vm34_vm3, %v131_v14  ;;  %vm73_vm4 = vcmask 1041409   ;;  %vm76_vm5 = vcmask 58368  }
   0x8   :  { %v89_v24 = vld [vmem:[%s169_s2] sm:$0x3] }
   0x9   :  { %101 = vset.pattern.permute.xlu0 %v46_v1 }
   0xe   :  { %v80_v21 = vld [vmem:[#allocation2] sm:$0x3] }
  0x11   :  { %49 = vperm.xlu0 %101, %v44_v3  }
  0x19   :  { %56 = vperm.xlu0 %101, %v51_v4  }
  0x83   :  { %v50_v7 = vpop.permute.xlu0 %49 }
  0x84   :  { %vm58_vm1 = vcmp.eq.s32.totalorder %v40_v5, %v50_v7 }
  0x85   :  { %v60_v8 = vsel %vm58_vm1, %v36_v6, 0.0 }
  0x86   :  { %v63_v9 = vsel %vm62_vm0, %v60_v8, 0.0 }
  0x87   :  { %64 = vadd.xlane.f32.xlu1 %v63_v9 }
  0x8b   :  { %v57_v11 = vpop.permute.xlu0 %56 }
  0x8c   :  { %vm59_vm2 = vcmp.eq.s32.totalorder %v40_v5, %v57_v11 }
  0x8d   :  { %v61_v12 = vsel %vm59_vm2, %v37_v10, 0.0 }
  0x8e   :  { %v66_v13 = vsel %vm62_vm0, %v61_v12, 0.0 }
  0x8f   :  { %67 = vadd.xlane.f32.xlu1 %v66_v13 }
  0xfa   :  { %v65_v15 = vpop.xlane.xlu1 %64 }
  0xfb   :  { %v71_v17 = vperm.slane %v65_v15, %v40_v5 }
 0x102   :  { %v68_v16 = vpop.xlane.xlu1 %67 }
 0x103   :  { %v72_v18 = vperm.slane %v68_v16, %v40_v5 }
 0x105   :  { %v74_v19 = vsel %vm73_vm4, %v72_v18, %v71_v17 }
 0x106   :  { %v77_v20 = vsel %vm76_vm5, %v74_v19, 0.0 }
 0x107   :  { %78 = vadd.xlane.f32.xlu2 %v77_v20 }
 0x17a   :  { %v79_v22 = vpop.xlane.xlu2 %78 }
 0x17b   :  { %v81_v23 = vadd.f32 %v80_v21, %v79_v22 }
 0x17d   :  { %83 = vst.msk [vmem:[#allocation2] sm:$0x3] %vm34_vm3, %v81_v23 }
 0x184   :  { %v87_v25 = vld [vmem:[#allocation2] sm:$0x3] }
 0x185   :  { %v88_v26 = vmul.f32 -0.125, %v87_v25 }
 0x187   :  { %v90_v27 = vmul.f32 %v89_v24, %v88_v26 }
 0x189   :  { %91 = vst.msk [vmem:[%s170_s3] sm:$0x3] %vm34_vm3, %v90_v27 }
 0x18a   :  { %96 = vsyncpa [#allocation4], 1 }

</bundles_post_ra>
